<compile_context>
chip_gen: v5e
topology: v5e:2x2
jax: 0.10.0
libtpu: 0.0.40
codegen_flags: <defaults>
</compile_context>

<pallas_src>
import jax
import jax.numpy as jnp
from jax.experimental import pallas as pl
from jax.experimental.pallas import tpu as pltpu


def _bcast_mul_kernel(x_ref, s_ref, o_ref):
    # x_ref: (BR, HW), s_ref: (BR, 1) -> lane-broadcast multiply on the VPU.
    o_ref[...] = x_ref[...] * s_ref[...]


def broadcast_channel_mul(x, scale):
    """x: (N, C, H, W), scale: (N, C, 1, 1) -> x * scale (NCHW)."""
    N, C, H, W = x.shape
    assert scale.shape == (N, C, 1, 1)
    NC = N * C
    HW = H * W

    x2d = x.reshape(NC, HW)
    s2d = scale.reshape(NC, 1)

    # Row-block size: multiple of the sublane packing (8 for 32-bit, 16 for
    # 16-bit dtypes), capped at 256 rows -> tile is a few hundred KiB.
    sub = 16 if jnp.dtype(x.dtype).itemsize == 2 else 8
    BR = min(256, ((NC + sub - 1) // sub) * sub)

    # Pad rows so the grid divides evenly (no ragged tail block).
    NC_pad = ((NC + BR - 1) // BR) * BR
    if NC_pad != NC:
        x2d = jnp.pad(x2d, ((0, NC_pad - NC), (0, 0)))
        s2d = jnp.pad(s2d, ((0, NC_pad - NC), (0, 0)))

    grid = (pl.cdiv(NC_pad, BR),)

    out2d = pl.pallas_call(
        _bcast_mul_kernel,
        out_shape=jax.ShapeDtypeStruct((NC_pad, HW), x.dtype),
        grid_spec=pl.GridSpec(
            grid=grid,
            in_specs=[
                pl.BlockSpec((BR, HW), lambda i: (i, 0)),
                pl.BlockSpec((BR, 1), lambda i: (i, 0)),
            ],
            out_specs=pl.BlockSpec((BR, HW), lambda i: (i, 0)),
        ),
        compiler_params=pltpu.CompilerParams(
            dimension_semantics=("parallel",),
        ),
    )(x2d, s2d)

    if NC_pad != NC:
        out2d = out2d[:NC]
    return out2d.reshape(N, C, H, W)


if __name__ == "__main__":
    key = jax.random.PRNGKey(0)
    k1, k2 = jax.random.split(key)

    # Shapes from the module: (1, 960, 14, 14) * (1, 960, 1, 1)
    N, C, H, W = 1, 960, 14, 14
    x312 = jax.random.normal(k1, (N, C, H, W), dtype=jnp.float32)
    x317 = jax.random.normal(k2, (N, C, 1, 1), dtype=jnp.float32)

    out = broadcast_channel_mul(x312, x317)
    out = jax.block_until_ready(out)

    # Correctness check against plain-JAX reference
    ref = x312 * x317
    assert out.shape == ref.shape
    assert jnp.allclose(out, ref, atol=1e-6, rtol=1e-6)

    print("KERNEL_OK")
</pallas_src>

<mosaic_0001>
module attributes {stable_mosaic.version = 11 : i64} {
  func.func @_bcast_mul_kernel(%arg0: i32, %arg1: memref<256x196xf32, #tpu.memory_space<vmem>>, %arg2: memref<256x1xf32, #tpu.memory_space<vmem>>, %arg3: memref<256x196xf32, #tpu.memory_space<vmem>>) attributes {dimension_semantics = [#tpu.dimension_semantics<parallel>], iteration_bounds = array<i64: 4>, scalar_prefetch = 0 : i64, scratch_operands = 0 : i64, tpu.core_type = #tpu.core_type<tc>, window_params = [{transform_indices = @transform_0, window_bounds = array<i64: 256, 196>}, {transform_indices = @transform_1, window_bounds = array<i64: 256, 1>}, {transform_indices = @transform_2, window_bounds = array<i64: 256, 196>}]} {
    %c0 = arith.constant 0 : index
    %c0_0 = arith.constant 0 : index
    %0 = vector.load %arg1[%c0, %c0_0] : memref<256x196xf32, #tpu.memory_space<vmem>>, vector<256x196xf32>
    %c0_1 = arith.constant 0 : index
    %c0_2 = arith.constant 0 : index
    %1 = vector.load %arg2[%c0_1, %c0_2] : memref<256x1xf32, #tpu.memory_space<vmem>>, vector<256x1xf32>
    %2 = vector.broadcast %1 : vector<256x1xf32> to vector<256x196xf32>
    %3 = arith.mulf %0, %2 : vector<256x196xf32>
    %c0_3 = arith.constant 0 : index
    %c0_4 = arith.constant 0 : index
    %4 = vector.load %arg3[%c0_3, %c0_4] : memref<256x196xf32, #tpu.memory_space<vmem>>, vector<256x196xf32>
    tpu.vector_store %arg3[%c0_3, %c0_4], %3 {strides = array<i32>} : memref<256x196xf32, #tpu.memory_space<vmem>>, vector<256x196xf32>,
    return
  }
  func.func @transform_0(%arg0: i32) -> (i32, i32) {
    %c0_i32 = arith.constant 0 : i32
    %c0_i32_0 = arith.constant 0 : i32
    return %arg0, %c0_i32 : i32, i32
  }
  func.func @transform_1(%arg0: i32) -> (i32, i32) {
    %c0_i32 = arith.constant 0 : i32
    %c0_i32_0 = arith.constant 0 : i32
    return %arg0, %c0_i32 : i32, i32
  }
  func.func @transform_2(%arg0: i32) -> (i32, i32) {
    %c0_i32 = arith.constant 0 : i32
    %c0_i32_0 = arith.constant 0 : i32
    return %arg0, %c0_i32 : i32, i32
  }
}

</mosaic_0001>

<bundles_post_ra>
// kernel: tpu_custom_call.1
= control target key start
LH: loop header
LB: loop body
LE: loop exit
PB: predicated region body
PF: predicated region fallthrough
CT: control target
= control target key end

     0   :  { %s682_s9 = smov 0   ;;  %s904_s0 = inlined_call_operand.vmem [shape: f32[1024,196], index: 0, kind: input, shape index: {}]   ;;  %s905_s1 = inlined_call_operand.vmem [shape: f32[1024,1], index: 1, kind: input, shape index: {}]   ;;  %s906_s2 = inlined_call_operand.vmem [shape: f32[1024,196], index: 2, kind: output, shape index: {}]  }
   0x1 LB: > { %s629_s10 = sadd.s32 4294967295, %s664_s9   ;;  %p633_p0 = scmp.ge.s32.totalorder %s664_s9, 1  ;;  %s664_s9 = sphi %s682_s9, %s12_s9  }
   0x2   : > { %p125_p1 = scmp.lt.s32.totalorder %s664_s9, 5 }
   0x4   : > { %p126_p2 = pnand %p633_p0, %p125_p1 }
   0x5   : > { %s634_s11 = sshll.u32 (!%p126_p2), %s629_s10, 5 }
   0x6   : > { %129 = sbr.rel (%p126_p2) target bundleno = 216 (0xd8), region = 28  ;;  %p155_p3 = scmp.lt.s32.totalorder (!%p126_p2), %s634_s11, 127 }
   0xb   : > { %v666_v0 = vmov 0   ;;  %s908_s11 = smov (!%p155_p3, %s634_s11), 127  ;;  %vm495_vm0 = vcmask 556032  }
   0xc   : > { %657 = vset.pattern.permute.xlu2 %v666_v0  ;;  %656 = vset.pattern.permute.xlu1 %v666_v0  ;;  %s638_s12 = sshll.u32 %s908_s11, 3  ;;  %s644_s16 = sshll.u32 %s908_s11, 4 }
   0xd   : > { %655 = vset.pattern.permute.xlu0 %v666_v0  ;;  %s696_s15 = scalar_lea.vmem %s905_s1, %s638_s12  ;;  %s734_s19 = scalar_lea.vmem %s904_s0, %s644_s16 }
   0xe   : > { %v242_v1 = vld [vmem:[%s696_s15 + $0x20] sm:$0xff]  ;;  %v240_v2 = vld [vmem:[%s696_s15 + $0x10] sm:$0xff]  ;;  %v243_v4 = vld [vmem:[%s696_s15 + $0x28] sm:$0xff]  ;;  %s741_s22 = scalar_lea.vmem %s906_s2, %s644_s16 }
   0xf   : > { %v238_v3 = vld [vmem:[%s696_s15] sm:$0xff]  ;;  %292 = vperm.xlu2 %657, %v242_v1   ;;  %282 = vperm.xlu1 %656, %v240_v2   ;;  %v241_v5 = vld [vmem:[%s696_s15 + $0x18] sm:$0xff]  ;;  %v239_v6 = vld [vmem:[%s696_s15 + $0x8] sm:$0xff] }
  0x10   : > { %272 = vperm.xlu0 %655, %v238_v3   ;;  %v246_v7 = vld [vmem:[%s696_s15 + $0x40] sm:$0xff]  ;;  %v245_v8 = vld [vmem:[%s696_s15 + $0x38] sm:$0xff]  ;;  %v244_v9 = vld [vmem:[%s696_s15 + $0x30] sm:$0xff] }
  0x11   : > { %v249_v10 = vld [vmem:[%s696_s15 + $0x58] sm:$0xff]  ;;  %v248_v11 = vld [vmem:[%s696_s15 + $0x50] sm:$0xff]  ;;  %v247_v12 = vld [vmem:[%s696_s15 + $0x48] sm:$0xff] }
  0x12   : > { %v252_v13 = vld [vmem:[%s696_s15 + $0x70] sm:$0xff]  ;;  %v251_v14 = vld [vmem:[%s696_s15 + $0x68] sm:$0xff]  ;;  %v250_v15 = vld [vmem:[%s696_s15 + $0x60] sm:$0xff] }
  0x13   : > { %v255_v16 = vld [vmem:[%s696_s15 + $0x88] sm:$0xff]  ;;  %v254_v17 = vld [vmem:[%s696_s15 + $0x80] sm:$0xff]  ;;  %v253_v18 = vld [vmem:[%s696_s15 + $0x78] sm:$0xff] }
  0x14   : > { %v258_v19 = vld [vmem:[%s696_s15 + $0xa0] sm:$0xff]  ;;  %v257_v20 = vld [vmem:[%s696_s15 + $0x98] sm:$0xff]  ;;  %v256_v21 = vld [vmem:[%s696_s15 + $0x90] sm:$0xff] }
  0x15   : > { %v261_v22 = vld [vmem:[%s696_s15 + $0xb8] sm:$0xff]  ;;  %v260_v23 = vld [vmem:[%s696_s15 + $0xb0] sm:$0xff]  ;;  %v259_v24 = vld [vmem:[%s696_s15 + $0xa8] sm:$0xff] }
  0x16   : > { %v264_v25 = vld [vmem:[%s696_s15 + $0xd0] sm:$0xff]  ;;  %v263_v26 = vld [vmem:[%s696_s15 + $0xc8] sm:$0xff]  ;;  %v262_v27 = vld [vmem:[%s696_s15 + $0xc0] sm:$0xff] }
  0x17   : > { %297 = vperm.xlu2 %657, %v243_v4   ;;  %287 = vperm.xlu1 %656, %v241_v5   ;;  %v267_v28 = vld [vmem:[%s696_s15 + $0xe8] sm:$0xff]  ;;  %v266_v29 = vld [vmem:[%s696_s15 + $0xe0] sm:$0xff]  ;;  %v265_v30 = vld [vmem:[%s696_s15 + $0xd8] sm:$0xff] }
  0x18   : > { %277 = vperm.xlu0 %655, %v239_v6   ;;  %v269_v31 = vld [vmem:[%s696_s15 + $0xf8] sm:$0xff]  ;;  %v268_v32 = vld [vmem:[%s696_s15 + $0xf0] sm:$0xff]  ;;  %v182_v33 = vld [vmem:[%s734_s19 + $0x40] sm:$0xff] }
  0x19   : > { %v183_v34 = vld [vmem:[%s734_s19 + $0x48] sm:$0xff]  ;;  %v184_v38 = vld [vmem:[%s734_s19 + $0x50] sm:$0xff]  ;;  %v185_v39 = vld [vmem:[%s734_s19 + $0x58] sm:$0xff] }
  0x1a   : > { %v190_v43 = vld [vmem:[%s734_s19 + $0x80] sm:$0xff]  ;;  %v191_v44 = vld [vmem:[%s734_s19 + $0x88] sm:$0xff]  ;;  %v196_v48 = vld [vmem:[%s734_s19 + $0xb0] sm:$0xff] }
  0x1b   : > { %v197_v49 = vld [vmem:[%s734_s19 + $0xb8] sm:$0xff]  ;;  %v178_v50 = vld [vmem:[%s734_s19 + $0x20] sm:$0xff]  ;;  %v179_v51 = vld [vmem:[%s734_s19 + $0x28] sm:$0xff] }
  0x1c   : > { %v174_v54 = vld [vmem:[%s734_s19] sm:$0xff]  ;;  %v175_v59 = vld [vmem:[%s734_s19 + $0x8] sm:$0xff]  ;;  %v180_v1 = vld [vmem:[%s734_s19 + $0x30] sm:$0xff] }
  0x1d   : > { %v202_v63 = vld [vmem:[%s734_s19 + $0xe0] sm:$0xff]  ;;  %v203_v0 = vld [vmem:[%s734_s19 + $0xe8] sm:$0xff]  ;;  %v181_v2 = vld [vmem:[%s734_s19 + $0x38] sm:$0xff] }
  0x1e   : > { %v176_v5 = vld [vmem:[%s734_s19 + $0x10] sm:$0xff] }
  0x1f   : > { %312 = vperm.xlu2 %657, %v246_v7   ;;  %307 = vperm.xlu1 %656, %v245_v8  }
  0x20   : > { %302 = vperm.xlu0 %655, %v244_v9  }
  0x27   : > { %327 = vperm.xlu2 %657, %v249_v10   ;;  %322 = vperm.xlu1 %656, %v248_v11   ;;  %v177_v10 = vld [vmem:[%s734_s19 + $0x18] sm:$0xff] }
  0x28   : > { %317 = vperm.xlu0 %655, %v247_v12  }
  0x2f   : > { %342 = vperm.xlu2 %657, %v252_v13   ;;  %337 = vperm.xlu1 %656, %v251_v14   ;;  %v208_v14 = vld [vmem:[%s734_s19 + $0x110] sm:$0xff] }
  0x30   : > { %332 = vperm.xlu0 %655, %v250_v15   ;;  %v209_v15 = vld [vmem:[%s734_s19 + $0x118] sm:$0xff] }
  0x37   : > { %357 = vperm.xlu2 %657, %v255_v16   ;;  %352 = vperm.xlu1 %656, %v254_v17   ;;  %v188_v16 = vld [vmem:[%s734_s19 + $0x70] sm:$0xff]  ;;  %v189_v17 = vld [vmem:[%s734_s19 + $0x78] sm:$0xff] }
  0x38   : > { %347 = vperm.xlu0 %655, %v253_v18  }
  0x3f   : > { %372 = vperm.xlu2 %657, %v258_v19   ;;  %367 = vperm.xlu1 %656, %v257_v20   ;;  %v186_v20 = vld [vmem:[%s734_s19 + $0x60] sm:$0xff] }
  0x40   : > { %362 = vperm.xlu0 %655, %v256_v21  }
  0x47   : > { %387 = vperm.xlu2 %657, %v261_v22   ;;  %382 = vperm.xlu1 %656, %v260_v23  }
  0x48   : > { %377 = vperm.xlu0 %655, %v259_v24  }
  0x4f   : > { %402 = vperm.xlu2 %657, %v264_v25   ;;  %397 = vperm.xlu1 %656, %v263_v26   ;;  %v187_v25 = vld [vmem:[%s734_s19 + $0x68] sm:$0xff] }
  0x50   : > { %392 = vperm.xlu0 %655, %v262_v27  }
  0x57   : > { %417 = vperm.xlu2 %657, %v267_v28   ;;  %412 = vperm.xlu1 %656, %v266_v29   ;;  %v214_v29 = vld [vmem:[%s734_s19 + $0x140] sm:$0xff] }
  0x58   : > { %407 = vperm.xlu0 %655, %v265_v30   ;;  %v215_v30 = vld [vmem:[%s734_s19 + $0x148] sm:$0xff] }
  0x5f   : > { %427 = vperm.xlu1 %656, %v269_v31   ;;  %v194_v31 = vld [vmem:[%s734_s19 + $0xa0] sm:$0xff] }
  0x60   : > { %422 = vperm.xlu0 %655, %v268_v32   ;;  %v195_v32 = vld [vmem:[%s734_s19 + $0xa8] sm:$0xff] }
  0x69   : > { %v293_v35 = vpop.permute.xlu2 %292 }
  0x6a   : > { %v438_v36 = vmul.f32 %v293_v35, %v182_v33  ;;  %v439_v37 = vmul.f32 %v293_v35, %v183_v34  ;;  %v192_v35 = vld [vmem:[%s734_s19 + $0x90] sm:$0xff] }
  0x6c   : > { %503 = vst [vmem:[%s741_s22 + $0x40] sm:$0xff] %v438_v36 }
  0x6d   : > { %504 = vst.msk [vmem:[%s741_s22 + $0x48] sm:$0xff] %vm495_vm0, %v439_v37 }
  0x71   : > { %v298_v40 = vpop.permute.xlu2 %297 }
  0x72   : > { %v440_v41 = vmul.f32 %v298_v40, %v184_v38  ;;  %v441_v42 = vmul.f32 %v298_v40, %v185_v39  ;;  %v193_v40 = vld [vmem:[%s734_s19 + $0x98] sm:$0xff] }
  0x74   : > { %505 = vst [vmem:[%s741_s22 + $0x50] sm:$0xff] %v440_v41 }
  0x75   : > { %506 = vst.msk [vmem:[%s741_s22 + $0x58] sm:$0xff] %vm495_vm0, %v441_v42 }
  0x79   : > { %v313_v45 = vpop.permute.xlu2 %312 }
  0x7a   : > { %v446_v46 = vmul.f32 %v313_v45, %v190_v43  ;;  %v447_v47 = vmul.f32 %v313_v45, %v191_v44  ;;  %v220_v44 = vld [vmem:[%s734_s19 + $0x170] sm:$0xff]  ;;  %v221_v45 = vld [vmem:[%s734_s19 + $0x178] sm:$0xff] }
  0x7c   : > { %511 = vst [vmem:[%s741_s22 + $0x80] sm:$0xff] %v446_v46  ;;  %v200_v46 = vld [vmem:[%s734_s19 + $0xd0] sm:$0xff] }
  0x7d   : > { %512 = vst.msk [vmem:[%s741_s22 + $0x88] sm:$0xff] %vm495_vm0, %v447_v47  ;;  %v201_v47 = vld [vmem:[%s734_s19 + $0xd8] sm:$0xff] }
  0x81   : > { %v328_v52 = vpop.permute.xlu2 %327  ;;  %v283_v53 = vpop.permute.xlu1 %282 }
  0x82   : > { %v452_v55 = vmul.f32 %v328_v52, %v196_v48  ;;  %v453_v56 = vmul.f32 %v328_v52, %v197_v49  ;;  %v434_v57 = vmul.f32 %v283_v53, %v178_v50  ;;  %v273_v58 = vpop.permute.xlu0 %272  ;;  %v435_v60 = vmul.f32 %v283_v53, %v179_v51  ;;  %v198_v50 = vld [vmem:[%s734_s19 + $0xc0] sm:$0xff] }
  0x83   : > { %v430_v61 = vmul.f32 %v273_v58, %v174_v54  ;;  %v431_v62 = vmul.f32 %v273_v58, %v175_v59  ;;  %v226_v59 = vld [vmem:[%s734_s19 + $0x1a0] sm:$0xff] }
  0x84   : > { %517 = vst [vmem:[%s741_s22 + $0xb0] sm:$0xff] %v452_v55  ;;  %v199_v55 = vld [vmem:[%s734_s19 + $0xc8] sm:$0xff] }
  0x85   : > { %518 = vst.msk [vmem:[%s741_s22 + $0xb8] sm:$0xff] %vm495_vm0, %v453_v56 }
  0x86   : > { %499 = vst [vmem:[%s741_s22 + $0x20] sm:$0xff] %v434_v57 }
  0x87   : > { %500 = vst.msk [vmem:[%s741_s22 + $0x28] sm:$0xff] %vm495_vm0, %v435_v60  ;;  %v227_v60 = vld [vmem:[%s734_s19 + $0x1a8] sm:$0xff] }
  0x88   : > { %494 = vst [vmem:[%s741_s22] sm:$0xff] %v430_v61  ;;  %v206_v61 = vld [vmem:[%s734_s19 + $0x100] sm:$0xff] }
  0x89   : > { %496 = vst.msk [vmem:[%s741_s22 + $0x8] sm:$0xff] %vm495_vm0, %v431_v62  ;;  %v343_v3 = vpop.permute.xlu2 %342  ;;  %v288_v4 = vpop.permute.xlu1 %287  ;;  %v207_v62 = vld [vmem:[%s734_s19 + $0x108] sm:$0xff] }
  0x8a   : > { %v458_v6 = vmul.f32 %v343_v3, %v202_v63  ;;  %v459_v7 = vmul.f32 %v343_v3, %v203_v0  ;;  %v436_v8 = vmul.f32 %v288_v4, %v180_v1  ;;  %v278_v9 = vpop.permute.xlu0 %277  ;;  %v437_v11 = vmul.f32 %v288_v4, %v181_v2  ;;  %v204_v1 = vld [vmem:[%s734_s19 + $0xf0] sm:$0xff] }
  0x8b   : > { %v432_v12 = vmul.f32 %v278_v9, %v176_v5  ;;  %v433_v13 = vmul.f32 %v278_v9, %v177_v10  ;;  %v232_v10 = vld [vmem:[%s734_s19 + $0x1d0] sm:$0xff] }
  0x8c   : > { %523 = vst [vmem:[%s741_s22 + $0xe0] sm:$0xff] %v458_v6  ;;  %v205_v6 = vld [vmem:[%s734_s19 + $0xf8] sm:$0xff] }
  0x8d   : > { %524 = vst.msk [vmem:[%s741_s22 + $0xe8] sm:$0xff] %vm495_vm0, %v459_v7 }
  0x8e   : > { %501 = vst [vmem:[%s741_s22 + $0x30] sm:$0xff] %v436_v8 }
  0x8f   : > { %502 = vst.msk [vmem:[%s741_s22 + $0x38] sm:$0xff] %vm495_vm0, %v437_v11  ;;  %v233_v11 = vld [vmem:[%s734_s19 + $0x1d8] sm:$0xff] }
  0x90   : > { %497 = vst [vmem:[%s741_s22 + $0x10] sm:$0xff] %v432_v12  ;;  %v212_v12 = vld [vmem:[%s734_s19 + $0x130] sm:$0xff] }
  0x91   : > { %498 = vst.msk [vmem:[%s741_s22 + $0x18] sm:$0xff] %vm495_vm0, %v433_v13  ;;  %v358_v18 = vpop.permute.xlu2 %357  ;;  %v308_v19 = vpop.permute.xlu1 %307  ;;  %v213_v13 = vld [vmem:[%s734_s19 + $0x138] sm:$0xff] }
  0x92   : > { %v464_v21 = vmul.f32 %v358_v18, %v208_v14  ;;  %v465_v22 = vmul.f32 %v358_v18, %v209_v15  ;;  %v444_v23 = vmul.f32 %v308_v19, %v188_v16  ;;  %v303_v24 = vpop.permute.xlu0 %302  ;;  %v445_v26 = vmul.f32 %v308_v19, %v189_v17  ;;  %v210_v16 = vld [vmem:[%s734_s19 + $0x120] sm:$0xff] }
  0x93   : > { %v442_v27 = vmul.f32 %v303_v24, %v186_v20  ;;  %v443_v28 = vmul.f32 %v303_v24, %v187_v25  ;;  %v218_v25 = vld [vmem:[%s734_s19 + $0x160] sm:$0xff] }
  0x94   : > { %529 = vst [vmem:[%s741_s22 + $0x110] sm:$0xff] %v464_v21  ;;  %v211_v21 = vld [vmem:[%s734_s19 + $0x128] sm:$0xff] }
  0x95   : > { %530 = vst.msk [vmem:[%s741_s22 + $0x118] sm:$0xff] %vm495_vm0, %v465_v22 }
  0x96   : > { %509 = vst [vmem:[%s741_s22 + $0x70] sm:$0xff] %v444_v23 }
  0x97   : > { %510 = vst.msk [vmem:[%s741_s22 + $0x78] sm:$0xff] %vm495_vm0, %v445_v26  ;;  %v219_v26 = vld [vmem:[%s734_s19 + $0x168] sm:$0xff] }
  0x98   : > { %507 = vst [vmem:[%s741_s22 + $0x60] sm:$0xff] %v442_v27  ;;  %v216_v27 = vld [vmem:[%s734_s19 + $0x150] sm:$0xff] }
  0x99   : > { %508 = vst.msk [vmem:[%s741_s22 + $0x68] sm:$0xff] %vm495_vm0, %v443_v28  ;;  %v373_v33 = vpop.permute.xlu2 %372  ;;  %v323_v34 = vpop.permute.xlu1 %322  ;;  %v217_v28 = vld [vmem:[%s734_s19 + $0x158] sm:$0xff] }
  0x9a   : > { %v470_v36 = vmul.f32 %v373_v33, %v214_v29  ;;  %v471_v37 = vmul.f32 %v373_v33, %v215_v30  ;;  %v450_v38 = vmul.f32 %v323_v34, %v194_v31  ;;  %v318_v39 = vpop.permute.xlu0 %317  ;;  %v451_v41 = vmul.f32 %v323_v34, %v195_v32 }
  0x9b   : > { %v448_v42 = vmul.f32 %v318_v39, %v192_v35  ;;  %v449_v43 = vmul.f32 %v318_v39, %v193_v40  ;;  %v224_v35 = vld [vmem:[%s734_s19 + $0x190] sm:$0xff] }
  0x9c   : > { %535 = vst [vmem:[%s741_s22 + $0x140] sm:$0xff] %v470_v36  ;;  %v225_v36 = vld [vmem:[%s734_s19 + $0x198] sm:$0xff] }
  0x9d   : > { %536 = vst.msk [vmem:[%s741_s22 + $0x148] sm:$0xff] %vm495_vm0, %v471_v37  ;;  %v222_v37 = vld [vmem:[%s734_s19 + $0x180] sm:$0xff] }
  0x9e   : > { %515 = vst [vmem:[%s741_s22 + $0xa0] sm:$0xff] %v450_v38  ;;  %v223_v38 = vld [vmem:[%s734_s19 + $0x188] sm:$0xff] }
  0x9f   : > { %516 = vst.msk [vmem:[%s741_s22 + $0xa8] sm:$0xff] %vm495_vm0, %v451_v41 }
  0xa0   : > { %513 = vst [vmem:[%s741_s22 + $0x90] sm:$0xff] %v448_v42 }
  0xa1   : > { %514 = vst.msk [vmem:[%s741_s22 + $0x98] sm:$0xff] %vm495_vm0, %v449_v43  ;;  %v388_v48 = vpop.permute.xlu2 %387  ;;  %v338_v49 = vpop.permute.xlu1 %337 }
  0xa2   : > { %v476_v51 = vmul.f32 %v388_v48, %v220_v44  ;;  %v477_v52 = vmul.f32 %v388_v48, %v221_v45  ;;  %v456_v53 = vmul.f32 %v338_v49, %v200_v46  ;;  %v333_v54 = vpop.permute.xlu0 %332  ;;  %v457_v56 = vmul.f32 %v338_v49, %v201_v47  ;;  %v230_v45 = vld [vmem:[%s734_s19 + $0x1c0] sm:$0xff]  ;;  %v231_v46 = vld [vmem:[%s734_s19 + $0x1c8] sm:$0xff]  ;;  %v228_v47 = vld [vmem:[%s734_s19 + $0x1b0] sm:$0xff] }
  0xa3   : > { %v454_v57 = vmul.f32 %v333_v54, %v198_v50  ;;  %v455_v58 = vmul.f32 %v333_v54, %v199_v55  ;;  %v229_v48 = vld [vmem:[%s734_s19 + $0x1b8] sm:$0xff]  ;;  %v236_v55 = vld [vmem:[%s734_s19 + $0x1f0] sm:$0xff] }
  0xa4   : > { %541 = vst [vmem:[%s741_s22 + $0x170] sm:$0xff] %v476_v51 }
  0xa5   : > { %542 = vst.msk [vmem:[%s741_s22 + $0x178] sm:$0xff] %vm495_vm0, %v477_v52 }
  0xa6   : > { %521 = vst [vmem:[%s741_s22 + $0xd0] sm:$0xff] %v456_v53 }
  0xa7   : > { %522 = vst.msk [vmem:[%s741_s22 + $0xd8] sm:$0xff] %vm495_vm0, %v457_v56  ;;  %v237_v56 = vld [vmem:[%s734_s19 + $0x1f8] sm:$0xff] }
  0xa8   : > { %519 = vst [vmem:[%s741_s22 + $0xc0] sm:$0xff] %v454_v57  ;;  %v234_v57 = vld [vmem:[%s734_s19 + $0x1e0] sm:$0xff] }
  0xa9   : > { %520 = vst.msk [vmem:[%s741_s22 + $0xc8] sm:$0xff] %vm495_vm0, %v455_v58  ;;  %v403_v63 = vpop.permute.xlu2 %402  ;;  %v353_v0 = vpop.permute.xlu1 %352  ;;  %v235_v58 = vld [vmem:[%s734_s19 + $0x1e8] sm:$0xff] }
  0xaa   : > { %v482_v2 = vmul.f32 %v403_v63, %v226_v59  ;;  %v483_v3 = vmul.f32 %v403_v63, %v227_v60  ;;  %v462_v4 = vmul.f32 %v353_v0, %v206_v61  ;;  %v348_v5 = vpop.permute.xlu0 %347  ;;  %v463_v7 = vmul.f32 %v353_v0, %v207_v62 }
  0xab   : > { %v460_v8 = vmul.f32 %v348_v5, %v204_v1  ;;  %v461_v9 = vmul.f32 %v348_v5, %v205_v6 }
  0xac   : > { %547 = vst [vmem:[%s741_s22 + $0x1a0] sm:$0xff] %v482_v2 }
  0xad   : > { %548 = vst.msk [vmem:[%s741_s22 + $0x1a8] sm:$0xff] %vm495_vm0, %v483_v3 }
  0xae   : > { %527 = vst [vmem:[%s741_s22 + $0x100] sm:$0xff] %v462_v4 }
  0xaf   : > { %528 = vst.msk [vmem:[%s741_s22 + $0x108] sm:$0xff] %vm495_vm0, %v463_v7 }
  0xb0   : > { %525 = vst [vmem:[%s741_s22 + $0xf0] sm:$0xff] %v460_v8 }
  0xb1   : > { %526 = vst.msk [vmem:[%s741_s22 + $0xf8] sm:$0xff] %vm495_vm0, %v461_v9  ;;  %v418_v14 = vpop.permute.xlu2 %417  ;;  %v368_v15 = vpop.permute.xlu1 %367 }
  0xb2   : > { %v488_v17 = vmul.f32 %v418_v14, %v232_v10  ;;  %v489_v18 = vmul.f32 %v418_v14, %v233_v11  ;;  %v468_v19 = vmul.f32 %v368_v15, %v212_v12  ;;  %v363_v20 = vpop.permute.xlu0 %362  ;;  %v469_v22 = vmul.f32 %v368_v15, %v213_v13 }
  0xb3   : > { %v466_v23 = vmul.f32 %v363_v20, %v210_v16  ;;  %v467_v24 = vmul.f32 %v363_v20, %v211_v21 }
  0xb4   : > { %553 = vst [vmem:[%s741_s22 + $0x1d0] sm:$0xff] %v488_v17 }
  0xb5   : > { %554 = vst.msk [vmem:[%s741_s22 + $0x1d8] sm:$0xff] %vm495_vm0, %v489_v18 }
  0xb6   : > { %533 = vst [vmem:[%s741_s22 + $0x130] sm:$0xff] %v468_v19 }
  0xb7   : > { %534 = vst.msk [vmem:[%s741_s22 + $0x138] sm:$0xff] %vm495_vm0, %v469_v22 }
  0xb8   : > { %531 = vst [vmem:[%s741_s22 + $0x120] sm:$0xff] %v466_v23 }
  0xb9   : > { %532 = vst.msk [vmem:[%s741_s22 + $0x128] sm:$0xff] %vm495_vm0, %v467_v24  ;;  %v383_v29 = vpop.permute.xlu1 %382 }
  0xba   : > { %v474_v30 = vmul.f32 %v383_v29, %v218_v25  ;;  %v475_v31 = vmul.f32 %v383_v29, %v219_v26  ;;  %v378_v32 = vpop.permute.xlu0 %377 }
  0xbb   : > { %v472_v33 = vmul.f32 %v378_v32, %v216_v27  ;;  %v473_v34 = vmul.f32 %v378_v32, %v217_v28 }
  0xbc   : > { %539 = vst [vmem:[%s741_s22 + $0x160] sm:$0xff] %v474_v30 }
  0xbd   : > { %540 = vst.msk [vmem:[%s741_s22 + $0x168] sm:$0xff] %vm495_vm0, %v475_v31 }
  0xbe   : > { %537 = vst [vmem:[%s741_s22 + $0x150] sm:$0xff] %v472_v33 }
  0xbf   : > { %538 = vst.msk [vmem:[%s741_s22 + $0x158] sm:$0xff] %vm495_vm0, %v473_v34 }
  0xc1   : > { %v398_v39 = vpop.permute.xlu1 %397 }
  0xc2   : > { %v480_v40 = vmul.f32 %v398_v39, %v224_v35  ;;  %v481_v41 = vmul.f32 %v398_v39, %v225_v36  ;;  %v393_v42 = vpop.permute.xlu0 %392 }
  0xc3   : > { %v478_v43 = vmul.f32 %v393_v42, %v222_v37  ;;  %v479_v44 = vmul.f32 %v393_v42, %v223_v38 }
  0xc4   : > { %545 = vst [vmem:[%s741_s22 + $0x190] sm:$0xff] %v480_v40 }
  0xc5   : > { %546 = vst.msk [vmem:[%s741_s22 + $0x198] sm:$0xff] %vm495_vm0, %v481_v41 }
  0xc6   : > { %543 = vst [vmem:[%s741_s22 + $0x180] sm:$0xff] %v478_v43 }
  0xc7   : > { %544 = vst.msk [vmem:[%s741_s22 + $0x188] sm:$0xff] %vm495_vm0, %v479_v44 }
  0xc9   : > { %v413_v49 = vpop.permute.xlu1 %412 }
  0xca   : > { %v486_v50 = vmul.f32 %v413_v49, %v230_v45  ;;  %v487_v51 = vmul.f32 %v413_v49, %v231_v46  ;;  %v408_v52 = vpop.permute.xlu0 %407 }
  0xcb   : > { %v484_v53 = vmul.f32 %v408_v52, %v228_v47  ;;  %v485_v54 = vmul.f32 %v408_v52, %v229_v48 }
  0xcc   : > { %551 = vst [vmem:[%s741_s22 + $0x1c0] sm:$0xff] %v486_v50 }
  0xcd   : > { %552 = vst.msk [vmem:[%s741_s22 + $0x1c8] sm:$0xff] %vm495_vm0, %v487_v51 }
  0xce   : > { %549 = vst [vmem:[%s741_s22 + $0x1b0] sm:$0xff] %v484_v53 }
  0xcf   : > { %550 = vst.msk [vmem:[%s741_s22 + $0x1b8] sm:$0xff] %vm495_vm0, %v485_v54 }
  0xd1   : > { %v428_v59 = vpop.permute.xlu1 %427 }
  0xd2   : > { %v492_v60 = vmul.f32 %v428_v59, %v236_v55  ;;  %v493_v61 = vmul.f32 %v428_v59, %v237_v56  ;;  %v423_v62 = vpop.permute.xlu0 %422 }
  0xd3   : > { %v490_v63 = vmul.f32 %v423_v62, %v234_v57  ;;  %v491_v0 = vmul.f32 %v423_v62, %v235_v58 }
  0xd4   : > { %557 = vst [vmem:[%s741_s22 + $0x1f0] sm:$0xff] %v492_v60 }
  0xd5   : > { %558 = vst.msk [vmem:[%s741_s22 + $0x1f8] sm:$0xff] %vm495_vm0, %v493_v61 }
  0xd6   : > { %555 = vst [vmem:[%s741_s22 + $0x1e0] sm:$0xff] %v490_v63 }
  0xd7   : > { %556 = vst.msk [vmem:[%s741_s22 + $0x1e8] sm:$0xff] %vm495_vm0, %v491_v0 }
  0xd8 PF: > { %s12_s9 = sadd.s32 1, %s664_s9  }
  0xd9   : > { %p9_p4 = scmp.ge.s32.totalorder %s12_s9, 6  }
  0xdb   :  { %11 = sbr.rel (!%p9_p4) target bundleno = 1 (0x1), region = 61 }

</bundles_post_ra>
